<compile_context>
chip_gen: v7x
topology: tpu7x:2x2x1
jax: 0.10.0
libtpu: 0.0.40
codegen_flags: <defaults>
</compile_context>

<pallas_src>
import jax
import jax.numpy as jnp
from jax.experimental import pallas as pl
from jax.experimental.pallas import tpu as pltpu

HIDDEN = 100        # logical hidden size from the PyTorch module
HIDDEN_PAD = 128    # lane-aligned padded hidden size


def _round_up(n, m):
    return (n + m - 1) // m * m


def _mlp_kernel(x_ref, w1_ref, b1_ref, w2_ref, b2_ref, w3_ref, b3_ref, o_ref):
    d_in = x_ref.shape[-1]

    # ---- layer 1: Linear + ReLU ----
    if d_in <= 8:
        # Tiny-K case: a K<=8 MXU pass still pays a full weight load; do it on the
        # VPU as d_in broadcast FMAs instead (f32, safe on v5e).
        x = x_ref[...]                                   # (tb, d_in) f32
        w1 = w1_ref[...].astype(jnp.float32)             # (d_in, 128)
        h1 = b1_ref[...]                                 # (1, 128) broadcasts up
        for k in range(d_in):
            h1 = h1 + x[:, k:k + 1] * w1[k:k + 1, :]
    else:
        x = x_ref[...].astype(jnp.bfloat16)
        h1 = jnp.dot(x, w1_ref[...], preferred_element_type=jnp.float32) + b1_ref[...]
    h1 = jnp.maximum(h1, 0.0).astype(jnp.bfloat16)

    # ---- layer 2: Linear + ReLU ----
    h2 = jnp.dot(h1, w2_ref[...], preferred_element_type=jnp.float32) + b2_ref[...]
    h2 = jnp.maximum(h2, 0.0).astype(jnp.bfloat16)

    # ---- output layer: Linear (no activation), narrow (tb, out_dim) store ----
    out = jnp.dot(h2, w3_ref[...], preferred_element_type=jnp.float32) + b3_ref[...]
    o_ref[...] = out.astype(o_ref.dtype)


def network_forward(x, kp, out_dim, *, block_b=2048):
    """x: (B, D_in) float32.  kp: padded kernel params.  Returns (B, out_dim) f32."""
    B, d_in = x.shape
    out_f = kp["w3"].shape[1]          # unpadded output feature dim (== out_dim)

    # VMEM bytes per batch row: 2x dbuf f32 input + 2x dbuf f32 output + ~4 live
    # (row,128) f32 intermediates.  Cap the tile so the footprint stays ~<=24 MiB
    # (safe on v7x's 64 MiB physical / 32 MiB scoped VMEM; v5e/v6e have headroom).
    per_row = 2 * d_in * 4 + 2 * out_f * 4 + 4 * HIDDEN_PAD * 4
    tb_cap = max(8, ((24 << 20) // per_row) // 8 * 8)
    block_b = min(block_b, tb_cap)

    # Tile selection: balanced tiles (no >=2x padded-row waste on awkward B) and
    # at least 2 grid steps when B is large enough, so v7x's 2nd TC isn't idle.
    n_tiles = pl.cdiv(B, block_b)
    if n_tiles == 1 and B >= 16:
        n_tiles = 2
    tb = _round_up(pl.cdiv(B, n_tiles), 8)
    b_pad = n_tiles * tb
    if b_pad != B:
        x = jnp.pad(x, ((0, b_pad - B), (0, 0)))

    # Explicit VMEM limit derived from the actual footprint (weights double-buffered
    # by default but tiny).
    w_bytes = 2 * ((d_in * HIDDEN_PAD + HIDDEN_PAD * HIDDEN_PAD + HIDDEN_PAD * out_f) * 2
                   + (2 * HIDDEN_PAD + out_f) * 4)
    tile_bytes = tb * per_row
    vmem_limit = int(min(48 << 20, max(16 << 20, tile_bytes + w_bytes + (2 << 20))))

    resident = lambda i: (0, 0)   # weights / biases stay VMEM-resident across batch tiles

    out_padded = pl.pallas_call(
        _mlp_kernel,
        out_shape=jax.ShapeDtypeStruct((b_pad, out_f), jnp.float32),
        grid=(b_pad // tb,),
        in_specs=[
            pl.BlockSpec((tb, d_in), lambda i: (i, 0)),         # x: tiled over batch
            pl.BlockSpec((d_in, HIDDEN_PAD), resident),         # w1
            pl.BlockSpec((1, HIDDEN_PAD), resident),            # b1
            pl.BlockSpec((HIDDEN_PAD, HIDDEN_PAD), resident),   # w2
            pl.BlockSpec((1, HIDDEN_PAD), resident),            # b2
            pl.BlockSpec((HIDDEN_PAD, out_f), resident),        # w3 (unpadded out dim)
            pl.BlockSpec((1, out_f), resident),                 # b3 (unpadded out dim)
        ],
        out_specs=pl.BlockSpec((tb, out_f), lambda i: (i, 0)),
        compiler_params=pltpu.CompilerParams(
            dimension_semantics=("parallel",),                  # 2 TCs on v7x; no-op on v5e/v6e
            vmem_limit_bytes=vmem_limit,
        ),
    )(x, kp["w1"], kp["b1"], kp["w2"], kp["b2"], kp["w3"], kp["b3"])

    # Only the batch axis may be padded; slice it off only when it actually was.
    return out_padded if b_pad == B else out_padded[:B]


def init_params(key, input_dimension, output_dimension):
    """Torch-like init (U(-1/sqrt(fan_in), +)).  Returns (kernel_params, ref_params)."""
    def linear(key, fan_in, fan_out):
        kw, kb = jax.random.split(key)
        bound = 1.0 / jnp.sqrt(jnp.float32(fan_in))
        w = jax.random.uniform(kw, (fan_in, fan_out), jnp.float32, -bound, bound)
        b = jax.random.uniform(kb, (1, fan_out), jnp.float32, -bound, bound)
        return w, b

    k1, k2, k3 = jax.random.split(key, 3)
    w1, b1 = linear(k1, input_dimension, HIDDEN)
    w2, b2 = linear(k2, HIDDEN, HIDDEN)
    w3, b3 = linear(k3, HIDDEN, output_dimension)
    ref = {"w1": w1, "b1": b1, "w2": w2, "b2": b2, "w3": w3, "b3": b3}

    hp = HIDDEN_PAD - HIDDEN

    # Zero-padded hidden rows/cols are numerically exact (ReLU(0)=0, zero rows add
    # nothing).  Output feature dim is left UNPADDED (narrow HBM writeback).
    kernel = {
        "w1": jnp.pad(w1, ((0, 0), (0, hp))).astype(jnp.bfloat16),
        "b1": jnp.pad(b1, ((0, 0), (0, hp))),
        "w2": jnp.pad(w2, ((0, hp), (0, hp))).astype(jnp.bfloat16),
        "b2": jnp.pad(b2, ((0, 0), (0, hp))),
        "w3": jnp.pad(w3, ((0, hp), (0, 0))).astype(jnp.bfloat16),
        "b3": b3,
    }
    return kernel, ref


def network_forward_ref(x, p):
    """Plain-JAX f32 reference for correctness checking."""
    h1 = jax.nn.relu(x @ p["w1"] + p["b1"])
    h2 = jax.nn.relu(h1 @ p["w2"] + p["b2"])
    return h2 @ p["w3"] + p["b3"]


if __name__ == "__main__":
    # Small shapes consistent with the module (DQN-style state -> Q-value net).
    batch, input_dimension, output_dimension = 8, 2, 4

    key = jax.random.PRNGKey(0)
    kx, kp = jax.random.split(key)
    x = jax.random.normal(kx, (batch, input_dimension), jnp.float32)
    kernel_params, ref_params = init_params(kp, input_dimension, output_dimension)

    out = network_forward(x, kernel_params, output_dimension)
    out = jax.block_until_ready(out)

    ref = network_forward_ref(x, ref_params)
    assert out.shape == (batch, output_dimension)
    # bf16 MXU operands / bf16-stored weights with f32 accumulation vs f32 reference.
    assert jnp.allclose(out, ref, atol=2e-2, rtol=2e-2), "mismatch vs JAX reference"

    print("KERNEL_OK")
</pallas_src>

<mosaic_0001>
module attributes {stable_mosaic.version = 11 : i64} {
  func.func @_mlp_kernel(%arg0: i32, %arg1: memref<8x2xf32, #tpu.memory_space<vmem>>, %arg2: memref<2x128xbf16, #tpu.memory_space<vmem>>, %arg3: memref<1x128xf32, #tpu.memory_space<vmem>>, %arg4: memref<128x128xbf16, #tpu.memory_space<vmem>>, %arg5: memref<1x128xf32, #tpu.memory_space<vmem>>, %arg6: memref<128x4xbf16, #tpu.memory_space<vmem>>, %arg7: memref<1x4xf32, #tpu.memory_space<vmem>>, %arg8: memref<8x4xf32, #tpu.memory_space<vmem>>) attributes {dimension_semantics = [#tpu.dimension_semantics<parallel>], iteration_bounds = array<i64: 1>, scalar_prefetch = 0 : i64, scratch_operands = 0 : i64, tpu.core_type = #tpu.core_type<tc>, window_params = [{transform_indices = @transform_0, window_bounds = array<i64: 8, 2>}, {pipeline_mode = #tpu.pipeline_mode<synchronous>, transform_indices = @transform_1, window_bounds = array<i64: 2, 128>}, {pipeline_mode = #tpu.pipeline_mode<synchronous>, transform_indices = @transform_2, window_bounds = array<i64: 1, 128>}, {pipeline_mode = #tpu.pipeline_mode<synchronous>, transform_indices = @transform_3, window_bounds = array<i64: 128, 128>}, {pipeline_mode = #tpu.pipeline_mode<synchronous>, transform_indices = @transform_4, window_bounds = array<i64: 1, 128>}, {pipeline_mode = #tpu.pipeline_mode<synchronous>, transform_indices = @transform_5, window_bounds = array<i64: 128, 4>}, {pipeline_mode = #tpu.pipeline_mode<synchronous>, transform_indices = @transform_6, window_bounds = array<i64: 1, 4>}, {transform_indices = @transform_7, window_bounds = array<i64: 8, 4>}]} {
    %c0 = arith.constant 0 : index
    %c0_0 = arith.constant 0 : index
    %0 = vector.load %arg1[%c0, %c0_0] : memref<8x2xf32, #tpu.memory_space<vmem>>, vector<8x2xf32>
    %c0_1 = arith.constant 0 : index
    %c0_2 = arith.constant 0 : index
    %1 = vector.load %arg2[%c0_1, %c0_2] : memref<2x128xbf16, #tpu.memory_space<vmem>>, vector<2x128xbf16>
    %2 = arith.extf %1 : vector<2x128xbf16> to vector<2x128xf32>
    %c0_3 = arith.constant 0 : index
    %c0_4 = arith.constant 0 : index
    %3 = vector.load %arg3[%c0_3, %c0_4] : memref<1x128xf32, #tpu.memory_space<vmem>>, vector<1x128xf32>
    %4 = vector.extract_strided_slice %0 {offsets = [0, 0], sizes = [8, 1], strides = [1, 1]} : vector<8x2xf32> to vector<8x1xf32>
    %5 = vector.extract_strided_slice %2 {offsets = [0, 0], sizes = [1, 128], strides = [1, 1]} : vector<2x128xf32> to vector<1x128xf32>
    %6 = vector.broadcast %4 : vector<8x1xf32> to vector<8x128xf32>
    %7 = vector.broadcast %5 : vector<1x128xf32> to vector<8x128xf32>
    %8 = arith.mulf %6, %7 : vector<8x128xf32>
    %9 = vector.broadcast %3 : vector<1x128xf32> to vector<8x128xf32>
    %10 = arith.addf %9, %8 : vector<8x128xf32>
    %11 = vector.extract_strided_slice %0 {offsets = [0, 1], sizes = [8, 1], strides = [1, 1]} : vector<8x2xf32> to vector<8x1xf32>
    %12 = vector.extract_strided_slice %2 {offsets = [1, 0], sizes = [1, 128], strides = [1, 1]} : vector<2x128xf32> to vector<1x128xf32>
    %13 = vector.broadcast %11 : vector<8x1xf32> to vector<8x128xf32>
    %14 = vector.broadcast %12 : vector<1x128xf32> to vector<8x128xf32>
    %15 = arith.mulf %13, %14 : vector<8x128xf32>
    %16 = arith.addf %10, %15 : vector<8x128xf32>
    %cst = arith.constant 0.000000e+00 : f32
    %17 = vector.broadcast %cst : f32 to vector<8x128xf32>
    %18 = arith.maximumf %16, %17 : vector<8x128xf32>
    %19 = arith.truncf %18 : vector<8x128xf32> to vector<8x128xbf16>
    %c0_5 = arith.constant 0 : index
    %c0_6 = arith.constant 0 : index
    %20 = vector.load %arg4[%c0_5, %c0_6] : memref<128x128xbf16, #tpu.memory_space<vmem>>, vector<128x128xbf16>
    %cst_7 = arith.constant dense<0.000000e+00> : vector<8x128xf32>
    %21 = tpu.matmul %19, %20, %cst_7 {dimension_numbers = #tpu.dot_dimension_numbers<[1], [0], [0], [1], [0, 0, 1, 1], [], []>} : vector<8x128xbf16>, vector<128x128xbf16>, vector<8x128xf32> -> vector<8x128xf32>
    %c0_8 = arith.constant 0 : index
    %c0_9 = arith.constant 0 : index
    %22 = vector.load %arg5[%c0_8, %c0_9] : memref<1x128xf32, #tpu.memory_space<vmem>>, vector<1x128xf32>
    %23 = vector.broadcast %22 : vector<1x128xf32> to vector<8x128xf32>
    %24 = arith.addf %21, %23 : vector<8x128xf32>
    %cst_10 = arith.constant 0.000000e+00 : f32
    %25 = vector.broadcast %cst_10 : f32 to vector<8x128xf32>
    %26 = arith.maximumf %24, %25 : vector<8x128xf32>
    %27 = arith.truncf %26 : vector<8x128xf32> to vector<8x128xbf16>
    %c0_11 = arith.constant 0 : index
    %c0_12 = arith.constant 0 : index
    %28 = vector.load %arg6[%c0_11, %c0_12] : memref<128x4xbf16, #tpu.memory_space<vmem>>, vector<128x4xbf16>
    %cst_13 = arith.constant dense<0.000000e+00> : vector<8x4xf32>
    %29 = tpu.matmul %27, %28, %cst_13 {dimension_numbers = #tpu.dot_dimension_numbers<[1], [0], [0], [1], [0, 0, 1, 1], [], []>} : vector<8x128xbf16>, vector<128x4xbf16>, vector<8x4xf32> -> vector<8x4xf32>
    %c0_14 = arith.constant 0 : index
    %c0_15 = arith.constant 0 : index
    %30 = vector.load %arg7[%c0_14, %c0_15] : memref<1x4xf32, #tpu.memory_space<vmem>>, vector<1x4xf32>
    %31 = vector.broadcast %30 : vector<1x4xf32> to vector<8x4xf32>
    %32 = arith.addf %29, %31 : vector<8x4xf32>
    %c0_16 = arith.constant 0 : index
    %c0_17 = arith.constant 0 : index
    %33 = vector.load %arg8[%c0_16, %c0_17] : memref<8x4xf32, #tpu.memory_space<vmem>>, vector<8x4xf32>
    tpu.vector_store %arg8[%c0_16, %c0_17], %32 {strides = array<i32>} : memref<8x4xf32, #tpu.memory_space<vmem>>, vector<8x4xf32>,
    return
  }
  func.func @transform_0(%arg0: i32) -> (i32, i32) {
    %c0_i32 = arith.constant 0 : i32
    %c0_i32_0 = arith.constant 0 : i32
    return %arg0, %c0_i32 : i32, i32
  }
  func.func @transform_1(%arg0: i32) -> (i32, i32) {
    %c0_i32 = arith.constant 0 : i32
    %c0_i32_0 = arith.constant 0 : i32
    %c0_i32_1 = arith.constant 0 : i32
    return %c0_i32, %c0_i32_0 : i32, i32
  }
  func.func @transform_2(%arg0: i32) -> (i32, i32) {
    %c0_i32 = arith.constant 0 : i32
    %c0_i32_0 = arith.constant 0 : i32
    %c0_i32_1 = arith.constant 0 : i32
    return %c0_i32, %c0_i32_0 : i32, i32
  }
  func.func @transform_3(%arg0: i32) -> (i32, i32) {
    %c0_i32 = arith.constant 0 : i32
    %c0_i32_0 = arith.constant 0 : i32
    %c0_i32_1 = arith.constant 0 : i32
    return %c0_i32, %c0_i32_0 : i32, i32
  }
  func.func @transform_4(%arg0: i32) -> (i32, i32) {
    %c0_i32 = arith.constant 0 : i32
    %c0_i32_0 = arith.constant 0 : i32
    %c0_i32_1 = arith.constant 0 : i32
    return %c0_i32, %c0_i32_0 : i32, i32
  }
  func.func @transform_5(%arg0: i32) -> (i32, i32) {
    %c0_i32 = arith.constant 0 : i32
    %c0_i32_0 = arith.constant 0 : i32
    %c0_i32_1 = arith.constant 0 : i32
    return %c0_i32, %c0_i32_0 : i32, i32
  }
  func.func @transform_6(%arg0: i32) -> (i32, i32) {
    %c0_i32 = arith.constant 0 : i32
    %c0_i32_0 = arith.constant 0 : i32
    %c0_i32_1 = arith.constant 0 : i32
    return %c0_i32, %c0_i32_0 : i32, i32
  }
  func.func @transform_7(%arg0: i32) -> (i32, i32) {
    %c0_i32 = arith.constant 0 : i32
    %c0_i32_0 = arith.constant 0 : i32
    return %arg0, %c0_i32 : i32, i32
  }
}

</mosaic_0001>

<bundles_post_ra>
// kernel: tpu_custom_call.1
= control target key start
LH: loop header
LB: loop body
LE: loop exit
PB: predicated region body
PF: predicated region fallthrough
CT: control target
= control target key end

     0   :  { %v389_v0 = vmov 0   ;;  %v390_v2 = vmov 0.0   ;;  %v391_v5 = vmov 1   ;;  %vm392_vm0 = vmmov 0   ;;  %s517_s0 = inlined_call_operand.vmem [shape: f32[8,2], index: 0, kind: input, shape index: {}]   ;;  %s518_s3 = inlined_call_operand.vmem [shape: bf16[128,128], index: 3, kind: input, shape index: {}]   ;;  %s519_s5 = inlined_call_operand.vmem [shape: bf16[128,4], index: 5, kind: input, shape index: {}]   ;;  %s520_s1 = inlined_call_operand.vmem [shape: bf16[2,128], index: 1, kind: input, shape index: {}]   ;;  %s521_s2 = inlined_call_operand.vmem [shape: f32[1,128], index: 2, kind: input, shape index: {}]   ;;  %s522_s4 = inlined_call_operand.vmem [shape: f32[1,128], index: 4, kind: input, shape index: {}]   ;;  %s523_s6 = inlined_call_operand.vmem [shape: f32[1,4], index: 6, kind: input, shape index: {}]   ;;  %s524_s7 = inlined_call_operand.vmem [shape: f32[8,4], index: 7, kind: output, shape index: {}]  }
   0x1   :  { %371 = vset.pattern.permute.xlu0 %v389_v0  ;;  %v27_v1 = vld [vmem:[%s517_s0] sm:$0xff]  ;;  %327 = vmatprep.subr.bf16.mxu0 %v390_v2  ;;  %v374_v4 = vld [vmem:[%s518_s3 + $0x8] sm:$0xff]   ;;  %v375_v6 = vld [vmem:[%s518_s3 + $0x10] sm:$0xff]   ;;  %v36_v18 = vlaneseq  ;;  %vm284_vm1 = vcmask 31744  }
   0x2   :  { %33 = vperm.xlu0 %371, %v27_v1   ;;  %v373_v3 = vld [vmem:[%s518_s3] sm:$0xff]   ;;  %347 = vmatprep.subr.bf16.mxu1 %v390_v2  ;;  %v376_v7 = vld [vmem:[%s518_s3 + $0x18] sm:$0xff]   ;;  %v382_v10 = vld [vmem:[%s519_s5 + $0x8] sm:$0xff]  }
   0x3   :  { %328 = vmatpush3.bf16.msra.mxu0 %v373_v3  ;;  %343 = vmatprep.mubr.msk.bf16.mxu0 %vm392_vm0, %v390_v2  ;;  %v377_v8 = vld [vmem:[%s518_s3 + $0x20] sm:$0xff]   ;;  %v378_v11 = vld [vmem:[%s518_s3 + $0x28] sm:$0xff]   ;;  %v383_v12 = vld [vmem:[%s519_s5 + $0x10] sm:$0xff]   ;;  %v37_v19 = vshrl.u32 %v36_v18, 7 }
   0x4   :  { %329 = vmatprep.subr.bf16.mxu0 %v390_v2  ;;  %363 = vmatprep.mubr.msk.bf16.mxu1 %vm392_vm0, %v390_v2  ;;  %v381_v9 = vld [vmem:[%s519_s5] sm:$0xff]   ;;  %v379_v13 = vld [vmem:[%s518_s3 + $0x30] sm:$0xff]   ;;  %v384_v14 = vld [vmem:[%s519_s5 + $0x18] sm:$0xff]  }
   0x5   :  { %348 = vmatpush3.bf16.msra.mxu1 %v381_v9  ;;  %v380_v15 = vld [vmem:[%s518_s3 + $0x38] sm:$0xff]   ;;  %v385_v16 = vld [vmem:[%s519_s5 + $0x20] sm:$0xff]   ;;  %v386_v17 = vld [vmem:[%s519_s5 + $0x28] sm:$0xff]   ;;  %v38_v22 = vsub.s32 0, %v37_v19  ;;  %v54_v24 = vsub.s32 1, %v37_v19 }
   0x6   :  { %372 = vset.pattern.permute.xlu0 %v391_v5  ;;  %349 = vmatprep.subr.bf16.mxu1 %v390_v2  ;;  %v28_v20 = vld [vmem:[%s520_s1] sm:$0x1]  ;;  %v387_v35 = vld [vmem:[%s519_s5 + $0x30] sm:$0xff]   ;;  %v388_v36 = vld [vmem:[%s519_s5 + $0x38] sm:$0xff]  }
   0x7   :  { %49 = vperm.xlu0 %372, %v27_v1   ;;  %330 = vmatpush3.bf16.msra.mxu0 %v374_v4  ;;  %v29_v21 = vunpack.c.l.bf16 %v28_v20  ;;  %v290_v28 = vld [vmem:[%s521_s2] ss:$0 sm:$0xff] }
   0x8   :  { %331 = vmatprep.subr.bf16.mxu0 %v390_v2  ;;  %v291_v37 = vld [vmem:[%s522_s4] ss:$0 sm:$0xff] }
   0x9   :  { %350 = vmatpush3.bf16.msra.mxu1 %v382_v10  ;;  %v39_v23 = vrot.slane %v29_v21, %v38_v22  ;;  %v55_v27 = vrot.slane %v29_v21, %v54_v24  ;;  %v300_v45 = vld [vmem:[%s523_s6] ss:$0 sm:$0xff] }
   0xa   :  { %351 = vmatprep.subr.bf16.mxu1 %v390_v2 }
   0xb   :  { %332 = vmatpush3.bf16.msra.mxu0 %v375_v6 }
   0xc   :  { %333 = vmatprep.subr.bf16.mxu0 %v390_v2 }
   0xd   :  { %352 = vmatpush3.bf16.msra.mxu1 %v383_v12 }
   0xe   :  { %353 = vmatprep.subr.bf16.mxu1 %v390_v2 }
   0xf   :  { %334 = vmatpush3.bf16.msra.mxu0 %v376_v7 }
  0x10   :  { %335 = vmatprep.subr.bf16.mxu0 %v390_v2 }
  0x11   :  { %354 = vmatpush3.bf16.msra.mxu1 %v384_v14 }
  0x12   :  { %355 = vmatprep.subr.bf16.mxu1 %v390_v2 }
  0x13   :  { %336 = vmatpush3.bf16.msra.mxu0 %v377_v8 }
  0x14   :  { %337 = vmatprep.subr.bf16.mxu0 %v390_v2 }
  0x15   :  { %356 = vmatpush3.bf16.msra.mxu1 %v385_v16 }
  0x16   :  { %357 = vmatprep.subr.bf16.mxu1 %v390_v2 }
  0x17   :  { %338 = vmatpush3.bf16.msra.mxu0 %v378_v11 }
  0x18   :  { %339 = vmatprep.subr.bf16.mxu0 %v390_v2 }
  0x19   :  { %358 = vmatpush3.bf16.msra.mxu1 %v386_v17 }
  0x1a   :  { %359 = vmatprep.subr.bf16.mxu1 %v390_v2 }
  0x1b   :  { %340 = vmatpush3.bf16.msra.mxu0 %v379_v13 }
  0x1c   :  { %341 = vmatprep.subr.bf16.mxu0 %v390_v2 }
  0x1d   :  { %360 = vmatpush3.bf16.msra.mxu1 %v387_v35 }
  0x1e   :  { %361 = vmatprep.subr.bf16.mxu1 %v390_v2 }
  0x1f   :  { %342 = vmatpush3.bf16.msra.mxu0 %v380_v15 }
  0x21   :  { %362 = vmatpush3.bf16.msra.mxu1 %v388_v36 }
  0x81   :  { %v34_v25 = vpop.permute.xlu0 %33 }
  0x82   :  { %v40_v26 = vmul.f32 %v39_v23, %v34_v25 }
  0x84   :  { %v47_v30 = vadd.f32 %v290_v28, %v40_v26 }
  0x86   :  { %v50_v29 = vpop.permute.xlu0 %49 }
  0x87   :  { %v56_v31 = vmul.f32 %v55_v27, %v50_v29 }
  0x89   :  { %v57_v32 = vadd.f32 %v56_v31, %v47_v30 }
  0x8b   :  { %v58_v33 = vmax.f32 %v57_v32, 0.0 }
  0x8d   :  { %v59_v34 = vpack.c.bf16 %v58_v33, %v58_v33 }
  0x8f   :  { %344 = vmatmul.mubr.bf16.vlgmr.msra.gmra.mrb[0].mxu0 %v59_v34 }
 0x162   :  { %v165_v38 = vpop.f32.mrb[0].mxu0 }
 0x163   :  { %v166_v39 = vadd.f32 %v291_v37, %v165_v38  ;;  %v345_v40 = vpop.f32.mrb[1].mxu0 }
 0x164   :  { %v168_v41 = vpop.f32.mrb[2].mxu0 }
 0x165   :  { %v171_v42 = vmax.f32 %v166_v39, 0.0  ;;  %v346_v43 = vpop.f32.mrb[3].mxu0 }
 0x167   :  { %v172_v44 = vpack.c.bf16 %v171_v42, %v171_v42 }
 0x169   :  { %364 = vmatmul.mubr.bf16.vlgmr.msra.gmra.mrb[0].mxu1 %v172_v44 }
 0x23c   :  { %v278_v46 = vpop.f32.mrb[0].mxu1 }
 0x23d   :  { %v279_v47 = vadd.f32 %v300_v45, %v278_v46  ;;  %v365_v48 = vpop.f32.mrb[1].mxu1 }
 0x23e   :  { %v281_v49 = vpop.f32.mrb[2].mxu1 }
 0x23f   :  { %285 = vst.msk [vmem:[%s524_s7] sm:$0xff] %vm284_vm1, %v279_v47  ;;  %v366_v50 = vpop.f32.mrb[3].mxu1 }

</bundles_post_ra>
